<compile_context>
chip_gen: v6e
topology: v6e:2x2x1
jax: 0.10.0
libtpu: 0.0.40
codegen_flags: <defaults>
</compile_context>

<pallas_src>
import functools

import jax
import jax.numpy as jnp
from jax.experimental import pallas as pl
from jax.experimental.pallas import tpu as pltpu

_LANE = 128


# ----------------------------------------------------------------------------
# Helpers
# ----------------------------------------------------------------------------
def _round_up(x, m):
    return ((x + m - 1) // m) * m


def _pad2d(a, rows, cols):
    return jnp.pad(a, ((0, rows - a.shape[0]), (0, cols - a.shape[1])))


def _pick_tile(n_pad, target, min_tiles=1):
    """Largest multiple of 128 that divides n_pad, is <= target, and (when
    possible) leaves at least `min_tiles` grid steps along that axis."""
    m = n_pad // _LANE
    cap = min(max(target // _LANE, 1), m)
    if min_tiles > 1 and m >= min_tiles:
        cap = min(cap, m // min_tiles)
    cap = max(cap, 1)
    for t in range(cap, 0, -1):
        if m % t == 0:
            return t * _LANE
    return _LANE


def _vmem_limit(estimate_bytes):
    # Headroom x2, floor at the common 32 MiB default, cap at v7x physical.
    return int(min(max(32 << 20, 2 * estimate_bytes), 64 << 20))


# ----------------------------------------------------------------------------
# Kernels
# ----------------------------------------------------------------------------
def _mlp_kernel(x_ref, *refs):
    """Fused MLP: relu-activated hidden layers + final linear (no bias).

    refs = (w0_ref, w1_ref, ..., w_last_ref, out_ref)
    All weights are [in_pad, out_pad] bf16, resident in VMEM; the x tile is
    [TM, D_pad] bf16.  Accumulation is f32 on the MXU; hidden activations are
    re-cast to bf16 between layers.
    """
    w_refs = refs[:-1]
    out_ref = refs[-1]

    h = x_ref[...]  # bf16
    for w_ref in w_refs[:-1]:
        acc = jnp.dot(h, w_ref[...], preferred_element_type=jnp.float32)
        h = jnp.maximum(acc, 0.0).astype(jnp.bfloat16)
    # Final classification layer: no activation.  Emit lane-padded bf16 so the
    # propagation kernel consumes it directly.
    logits = jnp.dot(h, w_refs[-1][...], preferred_element_type=jnp.float32)
    out_ref[...] = logits.astype(out_ref.dtype)


def _prop_kernel_resident_z(tile_k, p_ref, z_ref, out_ref, acc_ref):
    """out[i,:] = sum_k P[i,k] @ Z[k,:]; Z fully VMEM-resident, P streamed."""
    k = pl.program_id(1)

    @pl.when(k == 0)
    def _():
        acc_ref[...] = jnp.zeros_like(acc_ref)

    start = pl.multiple_of(k * tile_k, _LANE)
    z = z_ref[pl.ds(start, tile_k), :]
    acc_ref[...] += jnp.dot(p_ref[...], z, preferred_element_type=jnp.float32)

    @pl.when(k == pl.num_programs(1) - 1)
    def _():
        out_ref[...] = acc_ref[...].astype(out_ref.dtype)


def _prop_kernel_tiled_z(p_ref, z_ref, out_ref, acc_ref):
    """Fallback when Z is too large to keep resident: stream Z K-tiles too."""
    @pl.when(pl.program_id(1) == 0)
    def _():
        acc_ref[...] = jnp.zeros_like(acc_ref)

    acc_ref[...] += jnp.dot(
        p_ref[...], z_ref[...], preferred_element_type=jnp.float32
    )

    @pl.when(pl.program_id(1) == pl.num_programs(1) - 1)
    def _():
        out_ref[...] = acc_ref[...].astype(out_ref.dtype)


# ----------------------------------------------------------------------------
# One-time parameter preparation (hoisted out of the per-call forward path)
# ----------------------------------------------------------------------------
def prepare_params(weights_t, prop_matrix):
    """Pad every weight and the propagation matrix to lane-dense (128-multiple)
    shapes and cast to bf16 ONCE.  Zero rows/columns are mathematically a
    no-op (no bias, relu(0)==0) and padded output rows/cols are sliced off."""
    n = prop_matrix.shape[0]
    n_pad = _round_up(n, _LANE)

    in_pad = _round_up(weights_t[0].shape[0], _LANE)
    c_pad = _round_up(weights_t[-1].shape[1], _LANE)

    w_pads = []
    for w in weights_t[:-1]:
        out_pad_i = _round_up(w.shape[1], _LANE)
        w_pads.append(_pad2d(w, in_pad, out_pad_i).astype(jnp.bfloat16))
        in_pad = out_pad_i
    w_pads.append(_pad2d(weights_t[-1], in_pad, c_pad).astype(jnp.bfloat16))

    p_pad = _pad2d(prop_matrix, n_pad, n_pad).astype(jnp.bfloat16)
    return w_pads, p_pad


# ----------------------------------------------------------------------------
# Wrappers
# ----------------------------------------------------------------------------
def mlp_forward(x, w_pads, *, n_pad, tile_m, c_pad):
    """x: [N, D]; w_pads: pre-padded bf16 [in_pad, out_pad] weights.

    Returns lane-padded bf16 logits of shape [n_pad, c_pad].
    """
    d_pad = w_pads[0].shape[0]
    x_p = _pad2d(x, n_pad, d_pad).astype(jnp.bfloat16)

    grid = (n_pad // tile_m,)
    in_specs = [pl.BlockSpec((tile_m, d_pad), lambda i: (i, 0))]
    # Weights stay fully resident in VMEM; constant index -> single buffer.
    # TODO(synk): for very large hidden layers on v7x (64 MiB VMEM), K-tile the
    #             largest weight on an extra "arbitrary" grid axis instead.
    for w in w_pads:
        in_specs.append(
            pl.BlockSpec(w.shape, lambda i: (0, 0),
                         pipeline_mode=pl.Buffered(1))
        )

    w_bytes = sum(int(w.size) * 2 for w in w_pads)
    max_width = max(int(w.shape[1]) for w in w_pads)
    est = (2 * tile_m * d_pad * 2          # x tile, double-buffered
           + w_bytes                        # resident weights, single buffer
           + 2 * tile_m * c_pad * 2         # out tile, double-buffered
           + 2 * tile_m * max_width * 4)    # f32 activation temporaries
    return pl.pallas_call(
        _mlp_kernel,
        out_shape=jax.ShapeDtypeStruct((n_pad, c_pad), jnp.bfloat16),
        grid_spec=pltpu.PrefetchScalarGridSpec(
            num_scalar_prefetch=0,
            grid=grid,
            in_specs=in_specs,
            out_specs=pl.BlockSpec((tile_m, c_pad), lambda i: (i, 0)),
        ),
        compiler_params=pltpu.CompilerParams(
            dimension_semantics=("parallel",),
            vmem_limit_bytes=_vmem_limit(est),
        ),
    )(x_p, *w_pads)


def propagate(p_pad, logits_pad, *, tile_m, tile_k,
              z_resident_budget=8 << 20):
    """p_pad: [n_pad, n_pad] bf16 (pre-padded, pre-cast);
    logits_pad: [n_pad, c_pad] bf16.

    Returns f32 [n_pad, c_pad] = P_padded @ logits_pad (padded rows zero).
    """
    n_pad = p_pad.shape[0]
    c_pad = logits_pad.shape[1]
    grid = (n_pad // tile_m, n_pad // tile_k)

    z_bytes = n_pad * c_pad * 2
    z_resident = z_bytes <= z_resident_budget

    if z_resident:
        kernel = functools.partial(_prop_kernel_resident_z, tile_k)
        z_spec = pl.BlockSpec((n_pad, c_pad), lambda i, k: (0, 0),
                              pipeline_mode=pl.Buffered(1))
        z_vmem = z_bytes
    else:
        kernel = _prop_kernel_tiled_z
        z_spec = pl.BlockSpec((tile_k, c_pad), lambda i, k: (k, 0))
        z_vmem = 2 * tile_k * c_pad * 2

    est = (2 * tile_m * tile_k * 2         # P block, double-buffered
           + z_vmem                        # Z
           + tile_m * c_pad * 4            # f32 accumulator scratch
           + 2 * tile_m * c_pad * 4)       # f32 out tile, double-buffered
    return pl.pallas_call(
        kernel,
        out_shape=jax.ShapeDtypeStruct((n_pad, c_pad), jnp.float32),
        grid_spec=pltpu.PrefetchScalarGridSpec(
            num_scalar_prefetch=0,
            grid=grid,
            in_specs=[
                pl.BlockSpec((tile_m, tile_k), lambda i, k: (i, k)),
                z_spec,
            ],
            out_specs=pl.BlockSpec((tile_m, c_pad), lambda i, k: (i, 0)),
            scratch_shapes=[pltpu.VMEM((tile_m, c_pad), jnp.float32)],
        ),
        compiler_params=pltpu.CompilerParams(
            dimension_semantics=("parallel", "arbitrary"),
            vmem_limit_bytes=_vmem_limit(est),
        ),
    )(p_pad, logits_pad)


def level_class_forward(features, w_pads, p_pad, *, nclasses,
                        tile_m_target=512, tile_k_target=2048):
    """Mirrors LevelClass.forward: updates 'sentence_embedding' in the dict.

    w_pads / p_pad come from prepare_params() (one-time padding + bf16 cast).
    """
    x = features["sentence_embedding"]
    n = x.shape[0]
    n_pad = p_pad.shape[0]
    c_pad = w_pads[-1].shape[1]

    # Row tile: multiple of 128, divides n_pad, >=2 tiles when possible so the
    # "parallel" axis can be sharded across both v7x TensorCores.
    tile_m = _pick_tile(n_pad, tile_m_target, min_tiles=2)
    # Propagation K tile chosen independently (large P blocks -> DMA time
    # dominates the ~0.35 us per-grid-step overhead).
    tile_k = _pick_tile(n_pad, tile_k_target)

    logits_pad = mlp_forward(x, w_pads, n_pad=n_pad, tile_m=tile_m,
                             c_pad=c_pad)
    out_pad = propagate(p_pad, logits_pad, tile_m=tile_m, tile_k=tile_k)

    features = dict(features)
    features["sentence_embedding"] = out_pad[:n, :nclasses]
    return features


# ----------------------------------------------------------------------------
# Deterministic parameter construction (shapes from LevelClass.__init__)
# ----------------------------------------------------------------------------
def build_params(key, input_size, hiddenunits, nclasses):
    dims = [input_size] + list(hiddenunits) + [nclasses]
    weights_t = []
    for i in range(len(dims) - 1):
        key, sub = jax.random.split(key)
        fan_in, fan_out = dims[i], dims[i + 1]
        # PyTorch Linear weight is [out, in]; we store the transpose [in, out].
        w = jax.random.uniform(
            sub, (fan_in, fan_out), jnp.float32,
            minval=-1.0 / jnp.sqrt(fan_in), maxval=1.0 / jnp.sqrt(fan_in),
        )
        weights_t.append(w)
    return key, weights_t


if __name__ == "__main__":
    key = jax.random.PRNGKey(0)

    # Small shapes consistent with the module.
    N = 16              # number of nodes / sentences
    INPUT_SIZE = 32
    HIDDENUNITS = [64, 48]
    NCLASSES = 8

    key, weights_t = build_params(key, INPUT_SIZE, HIDDENUNITS, NCLASSES)

    key, kx, kp = jax.random.split(key, 3)
    x = jax.random.normal(kx, (N, INPUT_SIZE), jnp.float32)

    # Dense row-normalized propagation matrix (stand-in for `propagation`).
    p_raw = jax.random.uniform(kp, (N, N), jnp.float32)
    prop_matrix = p_raw / jnp.sum(p_raw, axis=1, keepdims=True)

    # One-time padding + bf16 cast (outside the per-call forward path).
    w_pads, p_pad = prepare_params(weights_t, prop_matrix)
    w_pads = [jax.block_until_ready(w) for w in w_pads]
    p_pad = jax.block_until_ready(p_pad)

    features = {"sentence_embedding": x}
    out = level_class_forward(features, w_pads, p_pad, nclasses=NCLASSES)
    result = jax.block_until_ready(out["sentence_embedding"])

    # Reference check in plain JAX (f32); kernel runs bf16 inputs w/ f32 accum.
    h = x
    for w in weights_t[:-1]:
        h = jnp.maximum(h @ w, 0.0)
    ref = prop_matrix @ (h @ weights_t[-1])
    assert result.shape == (N, NCLASSES)
    max_err = float(jnp.max(jnp.abs(result - ref)))
    assert jnp.allclose(result, ref, atol=5e-2, rtol=5e-2), max_err

    print("KERNEL_OK")
</pallas_src>

<mosaic_0001>
module attributes {stable_mosaic.version = 11 : i64} {
  func.func @_mlp_kernel(%arg0: i32, %arg1: memref<128x128xbf16, #tpu.memory_space<vmem>>, %arg2: memref<128x128xbf16, #tpu.memory_space<vmem>>, %arg3: memref<128x128xbf16, #tpu.memory_space<vmem>>, %arg4: memref<128x128xbf16, #tpu.memory_space<vmem>>, %arg5: memref<128x128xbf16, #tpu.memory_space<vmem>>) attributes {dimension_semantics = [#tpu.dimension_semantics<parallel>], iteration_bounds = array<i64: 1>, scalar_prefetch = 0 : i64, scratch_operands = 0 : i64, tpu.core_type = #tpu.core_type<tc>, window_params = [{transform_indices = @transform_0, window_bounds = array<i64: 128, 128>}, {pipeline_mode = #tpu.pipeline_mode<synchronous>, transform_indices = @transform_1, window_bounds = array<i64: 128, 128>}, {pipeline_mode = #tpu.pipeline_mode<synchronous>, transform_indices = @transform_2, window_bounds = array<i64: 128, 128>}, {pipeline_mode = #tpu.pipeline_mode<synchronous>, transform_indices = @transform_3, window_bounds = array<i64: 128, 128>}, {transform_indices = @transform_4, window_bounds = array<i64: 128, 128>}]} {
    %c0 = arith.constant 0 : index
    %c0_0 = arith.constant 0 : index
    %0 = vector.load %arg1[%c0, %c0_0] : memref<128x128xbf16, #tpu.memory_space<vmem>>, vector<128x128xbf16>
    %c0_1 = arith.constant 0 : index
    %c0_2 = arith.constant 0 : index
    %1 = vector.load %arg2[%c0_1, %c0_2] : memref<128x128xbf16, #tpu.memory_space<vmem>>, vector<128x128xbf16>
    %cst = arith.constant dense<0.000000e+00> : vector<128x128xf32>
    %2 = tpu.matmul %0, %1, %cst {dimension_numbers = #tpu.dot_dimension_numbers<[1], [0], [0], [1], [0, 0, 1, 1], [], []>} : vector<128x128xbf16>, vector<128x128xbf16>, vector<128x128xf32> -> vector<128x128xf32>
    %cst_3 = arith.constant 0.000000e+00 : f32
    %3 = vector.broadcast %cst_3 : f32 to vector<128x128xf32>
    %4 = arith.maximumf %2, %3 : vector<128x128xf32>
    %5 = arith.truncf %4 : vector<128x128xf32> to vector<128x128xbf16>
    %c0_4 = arith.constant 0 : index
    %c0_5 = arith.constant 0 : index
    %6 = vector.load %arg3[%c0_4, %c0_5] : memref<128x128xbf16, #tpu.memory_space<vmem>>, vector<128x128xbf16>
    %cst_6 = arith.constant dense<0.000000e+00> : vector<128x128xf32>
    %7 = tpu.matmul %5, %6, %cst_6 {dimension_numbers = #tpu.dot_dimension_numbers<[1], [0], [0], [1], [0, 0, 1, 1], [], []>} : vector<128x128xbf16>, vector<128x128xbf16>, vector<128x128xf32> -> vector<128x128xf32>
    %cst_7 = arith.constant 0.000000e+00 : f32
    %8 = vector.broadcast %cst_7 : f32 to vector<128x128xf32>
    %9 = arith.maximumf %7, %8 : vector<128x128xf32>
    %10 = arith.truncf %9 : vector<128x128xf32> to vector<128x128xbf16>
    %c0_8 = arith.constant 0 : index
    %c0_9 = arith.constant 0 : index
    %11 = vector.load %arg4[%c0_8, %c0_9] : memref<128x128xbf16, #tpu.memory_space<vmem>>, vector<128x128xbf16>
    %cst_10 = arith.constant dense<0.000000e+00> : vector<128x128xf32>
    %12 = tpu.matmul %10, %11, %cst_10 {dimension_numbers = #tpu.dot_dimension_numbers<[1], [0], [0], [1], [0, 0, 1, 1], [], []>} : vector<128x128xbf16>, vector<128x128xbf16>, vector<128x128xf32> -> vector<128x128xf32>
    %13 = arith.truncf %12 : vector<128x128xf32> to vector<128x128xbf16>
    %c0_11 = arith.constant 0 : index
    %c0_12 = arith.constant 0 : index
    %14 = vector.load %arg5[%c0_11, %c0_12] : memref<128x128xbf16, #tpu.memory_space<vmem>>, vector<128x128xbf16>
    tpu.vector_store %arg5[%c0_11, %c0_12], %13 {strides = array<i32>} : memref<128x128xbf16, #tpu.memory_space<vmem>>, vector<128x128xbf16>,
    return
  }
  func.func @transform_0(%arg0: i32) -> (i32, i32) {
    %c0_i32 = arith.constant 0 : i32
    %c0_i32_0 = arith.constant 0 : i32
    return %arg0, %c0_i32 : i32, i32
  }
  func.func @transform_1(%arg0: i32) -> (i32, i32) {
    %c0_i32 = arith.constant 0 : i32
    %c0_i32_0 = arith.constant 0 : i32
    %c0_i32_1 = arith.constant 0 : i32
    return %c0_i32, %c0_i32_0 : i32, i32
  }
  func.func @transform_2(%arg0: i32) -> (i32, i32) {
    %c0_i32 = arith.constant 0 : i32
    %c0_i32_0 = arith.constant 0 : i32
    %c0_i32_1 = arith.constant 0 : i32
    return %c0_i32, %c0_i32_0 : i32, i32
  }
  func.func @transform_3(%arg0: i32) -> (i32, i32) {
    %c0_i32 = arith.constant 0 : i32
    %c0_i32_0 = arith.constant 0 : i32
    %c0_i32_1 = arith.constant 0 : i32
    return %c0_i32, %c0_i32_0 : i32, i32
  }
  func.func @transform_4(%arg0: i32) -> (i32, i32) {
    %c0_i32 = arith.constant 0 : i32
    %c0_i32_0 = arith.constant 0 : i32
    return %arg0, %c0_i32 : i32, i32
  }
}

</mosaic_0001>

<bundles_post_ra>
// kernel: tpu_custom_call.1
= control target key start
LH: loop header
LB: loop body
LE: loop exit
PB: predicated region body
PF: predicated region fallthrough
CT: control target
= control target key end

     0   :  { %9 = vsyncpa [#allocation3], 0  ;;  %s1248_s0 = inlined_call_operand.hbm [shape: bf16[128,128], index: 0, kind: input, shape index: {}]   ;;  %s1249_s1 = inlined_call_operand.hbm [shape: bf16[128,128], index: 1, kind: input, shape index: {}]   ;;  %s1250_s2 = inlined_call_operand.hbm [shape: bf16[128,128], index: 2, kind: input, shape index: {}]   ;;  %s1251_s3 = inlined_call_operand.hbm [shape: bf16[128,128], index: 3, kind: input, shape index: {}]   ;;  %s1252_s4 = inlined_call_operand.hbm [shape: bf16[128,128], index: 4, kind: output, shape index: {}]  }
   0x1   :  { %10 = vsyncpa [#allocation6], 0 }
   0x2   :  { %11 = vsyncpa [#allocation9], 0 }
   0x3   :  { %12 = vsyncpa [#allocation4], 0  ;;  %s1186_s15 = smov [#allocation5]   ;;  %s1187_s17 = smov [#allocation2]  }
   0x4   :  { %s30_s16 = sshll.u32 %s1186_s15, 4  ;;  %s18_s18 = sshll.u32 %s1187_s17, 4  ;;  %s31_s16 = int_to_ptr.vmem [resolvable:$true] %s30_s16  ;;  %s19_s18 = int_to_ptr.vmem [resolvable:$true] %s18_s18 }
   0x5   :  { %s1086_s19 = scalar_lea.vmem %s31_s16, 1024  ;;  %p1091_p1 = scmp.lt.s32.totalorder %s31_s16, %s31_s16 }
   0x6   :  { %p1087_p0 = scmp.ne.s32.totalorder %s31_s16, %s1086_s19  ;;  %p1092_p2 = scmp.lt.s32.totalorder %s1086_s19, %s1086_s19 }
   0x8   :  { %p1093_p3 = por %p1092_p2, %p1091_p1 }
   0xa   :  { %p1094_p4 = pnand %p1093_p3, %p1087_p0 }
   0xc   :  { %1097 = shalt.err (!%p1094_p4)
}
   0xd   :  { %s1188_s20 = smov 64   ;;  %s1189_s21 = smov 4  }
   0xe   :  { %36 = dma.hbm_to_vmem [thread:$0]  %s1249_s1, 1024, %s31_s16, [#allocation6], %s1188_s20, %s1188_s20, %s1189_s21  }
   0xf   :  { %s1106_s24 = scalar_lea.vmem %s19_s18, 1024  ;;  %p1111_p6 = scmp.lt.s32.totalorder %s19_s18, %s19_s18 }
  0x10   :  { %p1107_p5 = scmp.ne.s32.totalorder %s19_s18, %s1106_s24  ;;  %p1112_p7 = scmp.lt.s32.totalorder %s1106_s24, %s1106_s24 }
  0x12   :  { %p1113_p8 = por %p1112_p7, %p1111_p6 }
  0x14   :  { %p1114_p9 = pnand %p1113_p8, %p1107_p5 }
  0x16   :  { %1117 = shalt.err (!%p1114_p9)
}
  0x17   :  { %24 = dma.hbm_to_vmem [thread:$0]  %s1248_s0, 1024, %s19_s18, [#allocation3], %s1188_s20, %s1188_s20, %s1189_s21  }
  0x18   :  { %s1190_s27 = smov [#allocation7]   ;;  %s1191_s29 = smov [#allocation8]  }
  0x19   :  { %s42_s28 = sshll.u32 %s1190_s27, 4  ;;  %s54_s30 = sshll.u32 %s1191_s29, 4  ;;  %s43_s28 = int_to_ptr.vmem [resolvable:$true] %s42_s28  ;;  %s55_s30 = int_to_ptr.vmem [resolvable:$true] %s54_s30 }
  0x1a   :  { %s1126_s1 = scalar_lea.vmem %s43_s28, 1024  ;;  %p1131_p11 = scmp.lt.s32.totalorder %s43_s28, %s43_s28 }
  0x1b   :  { %p1127_p10 = scmp.ne.s32.totalorder %s43_s28, %s1126_s1  ;;  %p1132_p12 = scmp.lt.s32.totalorder %s1126_s1, %s1126_s1 }
  0x1d   :  { %p1133_p13 = por %p1132_p12, %p1131_p11 }
  0x1f   :  { %p1134_p0 = pnand %p1133_p13, %p1127_p10 }
  0x21   :  { %1137 = shalt.err (!%p1134_p0)
}
  0x22   :  { %48 = dma.hbm_to_vmem [thread:$0]  %s1250_s2, 1024, %s43_s28, [#allocation6], %s1188_s20, %s1188_s20, %s1189_s21  }
  0x23   :  { %s1146_s0 = scalar_lea.vmem %s55_s30, 1024  ;;  %p1151_p2 = scmp.lt.s32.totalorder %s55_s30, %s55_s30 }
  0x24   :  { %p1147_p1 = scmp.ne.s32.totalorder %s55_s30, %s1146_s0  ;;  %p1152_p3 = scmp.lt.s32.totalorder %s1146_s0, %s1146_s0 }
  0x26   :  { %p1153_p4 = por %p1152_p3, %p1151_p2 }
  0x28   :  { %p1154_p5 = pnand %p1153_p4, %p1147_p1 }
  0x2a   :  { %1157 = shalt.err (!%p1154_p5)
}
  0x2b   :  { %60 = dma.hbm_to_vmem [thread:$0]  %s1251_s3, 1024, %s55_s30, [#allocation9], %s1188_s20, %s1188_s20, %s1189_s21  }
  0x2c   :  { %1178 = dma.done.wait [#allocation3], 1024  }
  0x2d   :  { %1179 = vsyncadd [#allocation3], 4294966272 }
  0x2e   :  { %1180 = dma.done.wait [#allocation6], 2048  }
  0x2f   :  { %1181 = vsyncadd [#allocation6], 4294965248 }
  0x30   :  { %1182 = dma.done.wait [#allocation9], 1024  }
  0x31   :  { %1183 = vsyncadd [#allocation9], 4294966272  ;;  %v1046_v0 = vld [vmem:[#allocation5 + $0x38] sm:$0xff]   ;;  %v1047_v1 = vld [vmem:[#allocation5 + $0x30] sm:$0xff]   ;;  %s1192_s2 = smov [#allocation10]  }
  0x32   :  { %927 = vmatprep.subr.bf16.mxu0 %v1046_v0  ;;  %v1048_v2 = vld [vmem:[#allocation5 + $0x28] sm:$0xff]   ;;  %v1049_v3 = vld [vmem:[#allocation5 + $0x20] sm:$0xff]   ;;  %v1050_v5 = vld [vmem:[#allocation5 + $0x18] sm:$0xff]   ;;  %s754_s3 = sshll.u32 %s1192_s2, 4  ;;  %s755_s3 = int_to_ptr.vmem [resolvable:$true] %s754_s3 }
  0x33   :  { %928 = vmatpush3.bf16.msra.mxu0 %v1046_v0  ;;  %v1054_v4 = vld [vmem:[#allocation2] sm:$0xff]   ;;  %v1051_v6 = vld [vmem:[#allocation5 + $0x10] sm:$0xff]   ;;  %v1062_v7 = vld [vmem:[#allocation7 + $0x38] sm:$0xff]   ;;  %s1158_s9 = scalar_lea.vmem %s755_s3, 1024  ;;  %p1163_p7 = scmp.lt.s32.totalorder %s755_s3, %s755_s3 }
  0x34   :  { %929 = vmatprep.subr.bf16.mxu0 %v1047_v1  ;;  %943 = vmatprep.mubr.bf16.mxu0 %v1054_v4  ;;  %v1063_v8 = vld [vmem:[#allocation7 + $0x30] sm:$0xff]   ;;  %v1052_v9 = vld [vmem:[#allocation5 + $0x8] sm:$0xff]   ;;  %v1053_v11 = vld [vmem:[#allocation5] sm:$0xff]   ;;  %p1159_p6 = scmp.ne.s32.totalorder %s755_s3, %s1158_s9  ;;  %p1164_p8 = scmp.lt.s32.totalorder %s1158_s9, %s1158_s9 }
  0x35   :  { %959 = vmatprep.subr.bf16.mxu1 %v1062_v7  ;;  %v1064_v10 = vld [vmem:[#allocation7 + $0x28] sm:$0xff]   ;;  %v1065_v12 = vld [vmem:[#allocation7 + $0x20] sm:$0xff]   ;;  %v1066_v13 = vld [vmem:[#allocation7 + $0x18] sm:$0xff]  }
  0x36   :  { %960 = vmatpush3.bf16.msra.mxu1 %v1062_v7  ;;  %v1055_v14 = vld [vmem:[#allocation2 + $0x8] sm:$0xff]   ;;  %v1056_v15 = vld [vmem:[#allocation2 + $0x10] sm:$0xff]   ;;  %v1057_v16 = vld [vmem:[#allocation2 + $0x18] sm:$0xff]   ;;  %p1165_p9 = por %p1164_p8, %p1163_p7 }
  0x37   :  { %930 = vmatpush3.bf16.msra.mxu0 %v1047_v1  ;;  %961 = vmatprep.subr.bf16.mxu1 %v1063_v8  ;;  %v1058_v17 = vld [vmem:[#allocation2 + $0x20] sm:$0xff]   ;;  %v1059_v18 = vld [vmem:[#allocation2 + $0x28] sm:$0xff]   ;;  %v1060_v19 = vld [vmem:[#allocation2 + $0x30] sm:$0xff]  }
  0x38   :  { %931 = vmatprep.subr.bf16.mxu0 %v1048_v2  ;;  %v1061_v20 = vld [vmem:[#allocation2 + $0x38] sm:$0xff]   ;;  %v1067_v21 = vld [vmem:[#allocation7 + $0x10] sm:$0xff]   ;;  %v1068_v22 = vld [vmem:[#allocation7 + $0x8] sm:$0xff]   ;;  %p1166_p10 = pnand %p1165_p9, %p1159_p6 }
  0x39   :  { %v1069_v23 = vld [vmem:[#allocation7] sm:$0xff]   ;;  %v1070_v24 = vld [vmem:[#allocation8 + $0x38] sm:$0xff]   ;;  %v1071_v25 = vld [vmem:[#allocation8 + $0x30] sm:$0xff]  }
  0x3a   :  { %962 = vmatpush3.bf16.msra.mxu1 %v1063_v8  ;;  %v1072_v26 = vld [vmem:[#allocation8 + $0x28] sm:$0xff]   ;;  %v1073_v27 = vld [vmem:[#allocation8 + $0x20] sm:$0xff]   ;;  %v1074_v28 = vld [vmem:[#allocation8 + $0x18] sm:$0xff]  }
  0x3b   :  { %932 = vmatpush3.bf16.msra.mxu0 %v1048_v2  ;;  %963 = vmatprep.subr.bf16.mxu1 %v1064_v10  ;;  %v1077_v7 = vld [vmem:[#allocation8] sm:$0xff]  }
  0x3c   :  { %933 = vmatprep.subr.bf16.mxu0 %v1049_v3 }
  0x3e   :  { %964 = vmatpush3.bf16.msra.mxu1 %v1064_v10 }
  0x3f   :  { %934 = vmatpush3.bf16.msra.mxu0 %v1049_v3  ;;  %965 = vmatprep.subr.bf16.mxu1 %v1065_v12 }
  0x40   :  { %935 = vmatprep.subr.bf16.mxu0 %v1050_v5 }
  0x42   :  { %966 = vmatpush3.bf16.msra.mxu1 %v1065_v12 }
  0x43   :  { %936 = vmatpush3.bf16.msra.mxu0 %v1050_v5  ;;  %967 = vmatprep.subr.bf16.mxu1 %v1066_v13  ;;  %v1075_v5 = vld [vmem:[#allocation8 + $0x10] sm:$0xff]  }
  0x44   :  { %937 = vmatprep.subr.bf16.mxu0 %v1051_v6 }
  0x46   :  { %968 = vmatpush3.bf16.msra.mxu1 %v1066_v13 }
  0x47   :  { %938 = vmatpush3.bf16.msra.mxu0 %v1051_v6  ;;  %969 = vmatprep.subr.bf16.mxu1 %v1067_v21  ;;  %v1076_v6 = vld [vmem:[#allocation8 + $0x8] sm:$0xff]  }
  0x48   :  { %939 = vmatprep.subr.bf16.mxu0 %v1052_v9 }
  0x4a   :  { %970 = vmatpush3.bf16.msra.mxu1 %v1067_v21 }
  0x4b   :  { %940 = vmatpush3.bf16.msra.mxu0 %v1052_v9  ;;  %971 = vmatprep.subr.bf16.mxu1 %v1068_v22 }
  0x4c   :  { %941 = vmatprep.subr.bf16.mxu0 %v1053_v11 }
  0x4e   :  { %972 = vmatpush3.bf16.msra.mxu1 %v1068_v22 }
  0x4f   :  { %942 = vmatpush3.bf16.msra.mxu0 %v1053_v11  ;;  %973 = vmatprep.subr.bf16.mxu1 %v1069_v23 }
  0x50   :  { %991 = vmatprep.subr.bf16.mxu0 %v1070_v24 }
  0x52   :  { %944 = vmatmul.mubr.bf16.vlgmr.msra.gmra.mxu0 %v1055_v14  ;;  %974 = vmatpush3.bf16.msra.mxu1 %v1069_v23 }
  0x53   :  { %947 = vmatprep.mubr.bf16.mxu0 %v1056_v15  ;;  %1023 = vmatprep.subr.bf16.mxu1 %v1070_v24 }
  0x54   :  { %992 = vmatpush3.bf16.msra.mxu0 %v1070_v24 }
  0x55   :  { %993 = vmatprep.subr.bf16.mxu0 %v1071_v25 }
  0x58   :  { %994 = vmatpush3.bf16.msra.mxu0 %v1071_v25 }
  0x59   :  { %995 = vmatprep.subr.bf16.mxu0 %v1072_v26 }
  0x5a   :  { %948 = vmatmul.mubr.bf16.gmra.mxu0 %v1057_v16 }
  0x5b   :  { %951 = vmatprep.mubr.bf16.mxu0 %v1058_v17 }
  0x5c   :  { %996 = vmatpush3.bf16.msra.mxu0 %v1072_v26 }
  0x5d   :  { %997 = vmatprep.subr.bf16.mxu0 %v1073_v27 }
  0x60   :  { %998 = vmatpush3.bf16.msra.mxu0 %v1073_v27 }
  0x61   :  { %999 = vmatprep.subr.bf16.mxu0 %v1074_v28 }
  0x62   :  { %952 = vmatmul.mubr.bf16.gmra.mxu0 %v1059_v18 }
  0x63   :  { %955 = vmatprep.mubr.bf16.mxu0 %v1060_v19 }
  0x64   :  { %1000 = vmatpush3.bf16.msra.mxu0 %v1074_v28 }
  0x65   :  { %1001 = vmatprep.subr.bf16.mxu0 %v1075_v5 }
  0x68   :  { %1002 = vmatpush3.bf16.msra.mxu0 %v1075_v5 }
  0x69   :  { %1003 = vmatprep.subr.bf16.mxu0 %v1076_v6 }
  0x6a   :  { %956 = vmatmul.mubr.bf16.gmra.mxu0 %v1061_v20 }
  0x6c   :  { %1004 = vmatpush3.bf16.msra.mxu0 %v1076_v6 }
  0x6d   :  { %1005 = vmatprep.subr.bf16.mxu0 %v1077_v7 }
  0x70   :  { %1006 = vmatpush3.bf16.msra.mxu0 %v1077_v7 }
 0x112   :  { %v945_v29 = vpop.f32.mrf.mxu0 }
 0x113   :  { %v301_v36 = vmax.f32 %v945_v29, 0.0 }
 0x114   :  { %v236_v30 = vpop.f32.mrf.mxu0 }
 0x115   :  { %v299_v34 = vmax.f32 %v236_v30, 0.0 }
 0x116   :  { %v946_v31 = vpop.f32.mrf.mxu0 }
 0x117   :  { %v302_v32 = vmax.f32 %v946_v31, 0.0 }
 0x118   :  { %v239_v33 = vpop.f32.mrf.mxu0 }
 0x119   :  { %v300_v35 = vmax.f32 %v239_v33, 0.0  ;;  %v316_v39 = vpack.c.bf16 %v302_v32, %v301_v36 }
 0x11a   :  { %v949_v37 = vpop.f32.mrf.mxu0 }
 0x11b   :  { %v315_v38 = vpack.c.bf16 %v300_v35, %v299_v34  ;;  %v305_v46 = vmax.f32 %v949_v37, 0.0 }
 0x11c   :  { %v252_v40 = vpop.f32.mrf.mxu0 }
 0x11d   :  { %975 = vmatprep.mubr.bf16.mxu1 %v315_v38  ;;  %v303_v44 = vmax.f32 %v252_v40, 0.0 }
 0x11e   :  { %v950_v41 = vpop.f32.mrf.mxu0  ;;  %976 = vmatmul.mubr.bf16.vlgmr.msra.gmra.mxu1 %v316_v39 }
 0x11f   :  { %1031 = vmatpush3.bf16.msra.mxu1 %v1070_v24  ;;  %v306_v42 = vmax.f32 %v950_v41, 0.0 }
 0x120   :  { %v255_v43 = vpop.f32.mrf.mxu0  ;;  %1024 = vmatprep.subr.bf16.mxu1 %v1071_v25 }
 0x121   :  { %v304_v45 = vmax.f32 %v255_v43, 0.0  ;;  %v318_v49 = vpack.c.bf16 %v306_v42, %v305_v46 }
 0x122   :  { %v953_v47 = vpop.f32.mrf.mxu0 }
 0x123   :  { %v317_v48 = vpack.c.bf16 %v304_v45, %v303_v44  ;;  %1032 = vmatpush3.bf16.msra.mxu1 %v1071_v25  ;;  %v309_v56 = vmax.f32 %v953_v47, 0.0 }
 0x124   :  { %v268_v50 = vpop.f32.mrf.mxu0  ;;  %1025 = vmatprep.subr.bf16.mxu1 %v1072_v26 }
 0x125   :  { %979 = vmatprep.mubr.bf16.mxu1 %v317_v48  ;;  %v307_v54 = vmax.f32 %v268_v50, 0.0 }
 0x126   :  { %v954_v51 = vpop.f32.mrf.mxu0  ;;  %980 = vmatmul.mubr.bf16.gmra.mxu1 %v318_v49 }
 0x127   :  { %1033 = vmatpush3.bf16.msra.mxu1 %v1072_v26  ;;  %v310_v52 = vmax.f32 %v954_v51, 0.0 }
 0x128   :  { %v271_v53 = vpop.f32.mrf.mxu0  ;;  %1026 = vmatprep.subr.bf16.mxu1 %v1073_v27 }
 0x129   :  { %v308_v55 = vmax.f32 %v271_v53, 0.0  ;;  %v320_v59 = vpack.c.bf16 %v310_v52, %v309_v56 }
 0x12a   :  { %v957_v57 = vpop.f32.mrf.mxu0 }
 0x12b   :  { %v319_v58 = vpack.c.bf16 %v308_v55, %v307_v54  ;;  %1034 = vmatpush3.bf16.msra.mxu1 %v1073_v27  ;;  %v313_v2 = vmax.f32 %v957_v57, 0.0 }
 0x12c   :  { %v284_v60 = vpop.f32.mrf.mxu0  ;;  %1027 = vmatprep.subr.bf16.mxu1 %v1074_v28 }
 0x12d   :  { %983 = vmatprep.mubr.bf16.mxu1 %v319_v58  ;;  %v311_v0 = vmax.f32 %v284_v60, 0.0 }
 0x12e   :  { %v958_v61 = vpop.f32.mrf.mxu0  ;;  %984 = vmatmul.mubr.bf16.gmra.mxu1 %v320_v59 }
 0x12f   :  { %1035 = vmatpush3.bf16.msra.mxu1 %v1074_v28  ;;  %v314_v62 = vmax.f32 %v958_v61, 0.0 }
 0x130   :  { %v287_v63 = vpop.f32.mrf.mxu0  ;;  %1028 = vmatprep.subr.bf16.mxu1 %v1075_v5 }
 0x131   :  { %v312_v1 = vmax.f32 %v287_v63, 0.0  ;;  %v322_v4 = vpack.c.bf16 %v314_v62, %v313_v2 }
 0x133   :  { %v321_v3 = vpack.c.bf16 %v312_v1, %v311_v0  ;;  %1036 = vmatpush3.bf16.msra.mxu1 %v1075_v5 }
 0x134   :  { %1029 = vmatprep.subr.bf16.mxu1 %v1076_v6 }
 0x135   :  { %987 = vmatprep.mubr.bf16.mxu1 %v321_v3 }
 0x136   :  { %988 = vmatmul.mubr.bf16.gmra.mxu1 %v322_v4 }
 0x137   :  { %1037 = vmatpush3.bf16.msra.mxu1 %v1076_v6 }
 0x138   :  { %1030 = vmatprep.subr.bf16.mxu1 %v1077_v7 }
 0x13b   :  { %1038 = vmatpush3.bf16.msra.mxu1 %v1077_v7 }
 0x1de   :  { %v977_v8 = vpop.f32.mrf.mxu1 }
 0x1df   :  { %v486_v15 = vmax.f32 %v977_v8, 0.0 }
 0x1e0   :  { %v421_v9 = vpop.f32.mrf.mxu1 }
 0x1e1   :  { %v484_v13 = vmax.f32 %v421_v9, 0.0 }
 0x1e2   :  { %v978_v10 = vpop.f32.mrf.mxu1 }
 0x1e3   :  { %v487_v11 = vmax.f32 %v978_v10, 0.0 }
 0x1e4   :  { %v424_v12 = vpop.f32.mrf.mxu1 }
 0x1e5   :  { %v485_v14 = vmax.f32 %v424_v12, 0.0  ;;  %v501_v18 = vpack.c.bf16 %v487_v11, %v486_v15 }
 0x1e6   :  { %v981_v16 = vpop.f32.mrf.mxu1 }
 0x1e7   :  { %v500_v17 = vpack.c.bf16 %v485_v14, %v484_v13  ;;  %v490_v25 = vmax.f32 %v981_v16, 0.0 }
 0x1e8   :  { %v437_v19 = vpop.f32.mrf.mxu1 }
 0x1e9   :  { %1007 = vmatprep.mubr.bf16.mxu0 %v500_v17  ;;  %v488_v23 = vmax.f32 %v437_v19, 0.0 }
 0x1ea   :  { %v982_v20 = vpop.f32.mrf.mxu1  ;;  %1008 = vmatmul.mubr.bf16.vlgmr.msra.gmra.mxu0 %v501_v18 }
 0x1eb   :  { %v491_v21 = vmax.f32 %v982_v20, 0.0 }
 0x1ec   :  { %v440_v22 = vpop.f32.mrf.mxu1 }
 0x1ed   :  { %v489_v24 = vmax.f32 %v440_v22, 0.0  ;;  %v503_v28 = vpack.c.bf16 %v491_v21, %v490_v25 }
 0x1ee   :  { %v985_v26 = vpop.f32.mrf.mxu1 }
 0x1ef   :  { %v502_v27 = vpack.c.bf16 %v489_v24, %v488_v23  ;;  %v494_v35 = vmax.f32 %v985_v26, 0.0 }
 0x1f0   :  { %v453_v29 = vpop.f32.mrf.mxu1 }
 0x1f1   :  { %1011 = vmatprep.mubr.bf16.mxu0 %v502_v27  ;;  %v492_v33 = vmax.f32 %v453_v29, 0.0 }
 0x1f2   :  { %v986_v30 = vpop.f32.mrf.mxu1  ;;  %1012 = vmatmul.mubr.bf16.gmra.mxu0 %v503_v28 }
 0x1f3   :  { %v495_v31 = vmax.f32 %v986_v30, 0.0 }
 0x1f4   :  { %v456_v32 = vpop.f32.mrf.mxu1 }
 0x1f5   :  { %v493_v34 = vmax.f32 %v456_v32, 0.0  ;;  %v505_v38 = vpack.c.bf16 %v495_v31, %v494_v35 }
 0x1f6   :  { %v989_v36 = vpop.f32.mrf.mxu1 }
 0x1f7   :  { %v504_v37 = vpack.c.bf16 %v493_v34, %v492_v33  ;;  %v498_v45 = vmax.f32 %v989_v36, 0.0 }
 0x1f8   :  { %v469_v39 = vpop.f32.mrf.mxu1 }
 0x1f9   :  { %1015 = vmatprep.mubr.bf16.mxu1 %v504_v37  ;;  %v496_v43 = vmax.f32 %v469_v39, 0.0 }
 0x1fa   :  { %v990_v40 = vpop.f32.mrf.mxu1  ;;  %1016 = vmatmul.mubr.bf16.vlgmr.msra.gmra.mxu1 %v505_v38 }
 0x1fb   :  { %v499_v41 = vmax.f32 %v990_v40, 0.0 }
 0x1fc   :  { %v472_v42 = vpop.f32.mrf.mxu1 }
 0x1fd   :  { %v497_v44 = vmax.f32 %v472_v42, 0.0  ;;  %v507_v47 = vpack.c.bf16 %v499_v41, %v498_v45 }
 0x1ff   :  { %v506_v46 = vpack.c.bf16 %v497_v44, %v496_v43 }
 0x201   :  { %1019 = vmatprep.mubr.bf16.mxu1 %v506_v46 }
 0x202   :  { %1020 = vmatmul.mubr.bf16.gmra.mxu1 %v507_v47 }
 0x2aa   :  { %v1009_v48 = vpop.f32.mrf.mxu0 }
 0x2ac   :  { %v606_v49 = vpop.f32.mrf.mxu0 }
 0x2ae   :  { %v1010_v50 = vpop.f32.mrf.mxu0 }
 0x2af   :  { %v840_v51 = vpack.c.bf16 %v1010_v50, %v1009_v48 }
 0x2b0   :  { %v609_v52 = vpop.f32.mrf.mxu0 }
 0x2b1   :  { %872 = vst [vmem:[#allocation10 + $0x8] sm:$0xff] %v840_v51   ;;  %v835_v53 = vpack.c.bf16 %v609_v52, %v606_v49 }
 0x2b2   :  { %v1013_v54 = vpop.f32.mrf.mxu0 }
 0x2b3   :  { %836 = vst [vmem:[#allocation10] sm:$0xff] %v835_v53  }
 0x2b4   :  { %v622_v55 = vpop.f32.mrf.mxu0 }
 0x2b6   :  { %v1014_v56 = vpop.f32.mrf.mxu0 }
 0x2b7   :  { %v850_v57 = vpack.c.bf16 %v1014_v56, %v1013_v54 }
 0x2b8   :  { %v625_v58 = vpop.f32.mrf.mxu0 }
 0x2b9   :  { %874 = vst [vmem:[#allocation10 + $0x18] sm:$0xff] %v850_v57   ;;  %v845_v59 = vpack.c.bf16 %v625_v58, %v622_v55 }
 0x2ba   :  { %v1017_v60 = vpop.f32.mrf.mxu1 }
 0x2bb   :  { %873 = vst [vmem:[#allocation10 + $0x10] sm:$0xff] %v845_v59  }
 0x2bc   :  { %v638_v61 = vpop.f32.mrf.mxu1 }
 0x2be   :  { %v1018_v62 = vpop.f32.mrf.mxu1 }
 0x2bf   :  { %v860_v63 = vpack.c.bf16 %v1018_v62, %v1017_v60 }
 0x2c0   :  { %v641_v0 = vpop.f32.mrf.mxu1 }
 0x2c1   :  { %876 = vst [vmem:[#allocation10 + $0x28] sm:$0xff] %v860_v63   ;;  %v855_v1 = vpack.c.bf16 %v641_v0, %v638_v61 }
 0x2c2   :  { %v1021_v2 = vpop.f32.mrf.mxu1 }
 0x2c3   :  { %875 = vst [vmem:[#allocation10 + $0x20] sm:$0xff] %v855_v1  }
 0x2c4   :  { %v654_v3 = vpop.f32.mrf.mxu1 }
 0x2c6   :  { %v1022_v4 = vpop.f32.mrf.mxu1 }
 0x2c7   :  { %v870_v5 = vpack.c.bf16 %v1022_v4, %v1021_v2 }
 0x2c8   :  { %v657_v6 = vpop.f32.mrf.mxu1 }
 0x2c9   :  { %878 = vst [vmem:[#allocation10 + $0x38] sm:$0xff] %v870_v5   ;;  %v865_v7 = vpack.c.bf16 %v657_v6, %v654_v3 }
 0x2cb   :  { %877 = vst [vmem:[#allocation10 + $0x30] sm:$0xff] %v865_v7  }
 0x2cc   :  { %1169 = shalt.err (!%p1166_p10)
}
 0x2cd   :  { %760 = dma.vmem_to_hbm [thread:$0]  %s755_s3, 1024, %s1252_s4, [#allocation4], %s1188_s20, %s1188_s20, %s1189_s21  }
 0x2ce   :  { %1184 = dma.done.wait [#allocation4], 1024  }
 0x2cf   :  { %1185 = vsyncadd [#allocation4], 4294966272 }
 0x2d0   :  { %764 = vsyncpa [#allocation3], 1 }
 0x2d1   :  { %765 = vsyncpa [#allocation6], 1 }
 0x2d2   :  { %766 = vsyncpa [#allocation9], 1 }
 0x2d3   :  { %767 = vsyncpa [#allocation4], 1 }

</bundles_post_ra>
